<compile_context>
chip_gen: v7x
topology: tpu7x:2x2x1
jax: 0.10.0
libtpu: 0.0.40
codegen_flags: <defaults>
</compile_context>

<pallas_src>
import functools

import jax
import jax.numpy as jnp
from jax import lax
from jax.experimental import pallas as pl
from jax.experimental.pallas import tpu as pltpu

HIDDEN = 32
IN_DIM = 5
OUT_DIM = 2
N_LAYERS = 5
CHUNK = 256              # lane sub-block; 5-layer chain per chunk lives in vregs
INNER_UNROLL = 2         # independent chunk streams per loop step (dual MXU)
DEFAULT_TILE_N = 16384   # max rows per grid step (lane axis); multiple of CHUNK


def _round_up(x, m):
    return (x + m - 1) // m * m


def _use_bf16_tanh():
    """bf16 EUP transcendentals exist on v6e/v7x; keep f32 tanh elsewhere."""
    try:
        kind = jax.devices()[0].device_kind.lower()
    except Exception:
        return False
    return ("v6" in kind) or ("v7" in kind)


def _mlp_kernel(x_ref, w_ref, b_ref, o_ref, *, tanh_in_bf16):
    # x_ref: (IN_DIM, tile_n)  bf16   feature-major, batch on lanes
    # w_ref: (5, 32, 32)       bf16   packed zero-padded weight slab, (out, in)
    # b_ref: (5, 32, 1)        f32    packed zero-padded bias slab
    # o_ref: (OUT_DIM, tile_n) f32
    tile_n = x_ref.shape[1]
    n_chunks = tile_n // CHUNK

    # Weights/biases loaded once per grid step, hoisted out of the chunk loop.
    w1 = w_ref[0, :, :IN_DIM]        # (32, 5)
    w2 = w_ref[1]                    # (32, 32)
    w3 = w_ref[2]
    w4 = w_ref[3]
    w5 = w_ref[4, :OUT_DIM, :]       # (2, 32)
    b1 = b_ref[0]                    # (32, 1) f32
    b2 = b_ref[1]
    b3 = b_ref[2]
    b4 = b_ref[3]
    b5 = b_ref[4, :OUT_DIM, :]       # (2, 1)  f32

    def act(a):
        # Hidden activation; next MXU operand is bf16 either way.
        if tanh_in_bf16:
            return jnp.tanh(a.astype(jnp.bfloat16))      # packed bf16 EUP (v6e/v7x)
        return jnp.tanh(a).astype(jnp.bfloat16)          # f32 EUP (v5e)

    def body(c, carry):
        col = pl.multiple_of(c * CHUNK, CHUNK)
        h = x_ref[:, pl.ds(col, CHUNK)]                                  # (5, CHUNK) bf16
        h = act(jnp.dot(w1, h, preferred_element_type=jnp.float32) + b1)
        h = act(jnp.dot(w2, h, preferred_element_type=jnp.float32) + b2)
        h = act(jnp.dot(w3, h, preferred_element_type=jnp.float32) + b3)
        h = act(jnp.dot(w4, h, preferred_element_type=jnp.float32) + b4)
        out = jnp.dot(w5, h, preferred_element_type=jnp.float32) + b5    # (2, CHUNK) f32
        o_ref[:, pl.ds(col, CHUNK)] = out.astype(o_ref.dtype)
        return carry

    lax.fori_loop(0, n_chunks, body, 0, unroll=min(INNER_UNROLL, n_chunks))


def mymlp_forward(x, params, tile_n=None):
    """x: any shape whose element count is a multiple of 5 (torch-style view(-1, 5))."""
    x2d = x.reshape(-1, IN_DIM)
    n = x2d.shape[0]

    if tile_n is None:
        n_aligned = _round_up(max(n, 1), CHUNK)
        # Cap tile at ~half the batch so the grid has >=2 steps when possible,
        # letting ("parallel",) shard the batch axis across v7x's 2 TensorCores.
        half = _round_up(-(-n_aligned // 2), CHUNK)
        tile_n = max(CHUNK, min(DEFAULT_TILE_N, half))
    tile_n = _round_up(tile_n, CHUNK)
    n_pad = _round_up(max(n, 1), tile_n)

    # Single fused cast + transpose + pad pass (feature-major, batch on lanes).
    xt = jnp.pad(x2d.astype(jnp.bfloat16).T, ((0, 0), (0, n_pad - n)))

    # Pack weights / biases into one bf16 slab + one f32 slab (2 resident inputs).
    (w1, b1), (w2, b2), (w3, b3), (w4, b4), (w5, b5) = params
    w_slab = jnp.zeros((N_LAYERS, HIDDEN, HIDDEN), jnp.bfloat16)
    w_slab = w_slab.at[0, :, :IN_DIM].set(w1.astype(jnp.bfloat16))
    w_slab = w_slab.at[1].set(w2.astype(jnp.bfloat16))
    w_slab = w_slab.at[2].set(w3.astype(jnp.bfloat16))
    w_slab = w_slab.at[3].set(w4.astype(jnp.bfloat16))
    w_slab = w_slab.at[4, :OUT_DIM, :].set(w5.astype(jnp.bfloat16))

    b_slab = jnp.zeros((N_LAYERS, HIDDEN, 1), jnp.float32)
    b_slab = b_slab.at[0, :, 0].set(b1.astype(jnp.float32))
    b_slab = b_slab.at[1, :, 0].set(b2.astype(jnp.float32))
    b_slab = b_slab.at[2, :, 0].set(b3.astype(jnp.float32))
    b_slab = b_slab.at[3, :, 0].set(b4.astype(jnp.float32))
    b_slab = b_slab.at[4, :OUT_DIM, 0].set(b5.astype(jnp.float32))

    kernel = functools.partial(_mlp_kernel, tanh_in_bf16=_use_bf16_tanh())

    grid = (n_pad // tile_n,)
    out_t = pl.pallas_call(
        kernel,
        out_shape=jax.ShapeDtypeStruct((OUT_DIM, n_pad), jnp.float32),
        grid=grid,
        in_specs=[
            pl.BlockSpec((IN_DIM, tile_n), lambda i: (0, i)),
            # Constant block index -> DMA'd once, VMEM-resident across grid steps.
            pl.BlockSpec((N_LAYERS, HIDDEN, HIDDEN), lambda i: (0, 0, 0)),
            pl.BlockSpec((N_LAYERS, HIDDEN, 1), lambda i: (0, 0, 0)),
        ],
        out_specs=pl.BlockSpec((OUT_DIM, tile_n), lambda i: (0, i)),
        compiler_params=pltpu.CompilerParams(
            dimension_semantics=("parallel",),
            vmem_limit_bytes=32 * 1024 * 1024),
    )(xt, w_slab, b_slab)

    # Batch-major (n, 2) to match the PyTorch module's output layout.
    return out_t[:, :n].T


def init_params(key):
    """Deterministic init mimicking nn.Linear default (uniform +-1/sqrt(fan_in)).

    Weights stored PyTorch-native (out_features, in_features); biases (out_features,).
    """
    dims = [(HIDDEN, IN_DIM), (HIDDEN, HIDDEN), (HIDDEN, HIDDEN),
            (HIDDEN, HIDDEN), (OUT_DIM, HIDDEN)]
    params = []
    for (fan_out, fan_in) in dims:
        key, kw, kb = jax.random.split(key, 3)
        bound = 1.0 / jnp.sqrt(fan_in)
        w = jax.random.uniform(kw, (fan_out, fan_in), jnp.float32, -bound, bound)
        b = jax.random.uniform(kb, (fan_out,), jnp.float32, -bound, bound)
        params.append((w, b))
    return params


def reference_forward(x, params):
    """Plain-JAX f32 reference (eval-mode dropout = identity)."""
    h = x.reshape(-1, IN_DIM).astype(jnp.float32)
    n_layers = len(params)
    for i, (w, b) in enumerate(params):
        h = h @ w.T + b
        if i < n_layers - 1:
            h = jnp.tanh(h)
    return h


if __name__ == "__main__":
    key = jax.random.PRNGKey(0)
    key, kx = jax.random.split(key)

    # Small input: (2, 4, 16, 5) — forward flattens it to (128, 5), like x.view(-1, 5).
    x = jax.random.normal(kx, (2, 4, 16, IN_DIM), dtype=jnp.float32)
    params = init_params(key)

    out = jax.block_until_ready(mymlp_forward(x, params))
    ref = reference_forward(x, params)

    assert out.shape == (128, OUT_DIM), out.shape
    max_err = float(jnp.max(jnp.abs(out - ref)))
    # bf16 matmul operands / bf16 inter-layer activations (f32 MXU accumulation)
    # -> loosened tolerance vs the f32 reference.
    assert jnp.allclose(out, ref, atol=7.5e-2, rtol=7.5e-2), \
        f"mismatch, max_err={max_err}"

    print("KERNEL_OK")
</pallas_src>

<mosaic_0001>
module attributes {stable_mosaic.version = 11 : i64} {
  func.func @_mlp_kernel(%arg0: i32, %arg1: memref<5x256xbf16, #tpu.memory_space<vmem>>, %arg2: memref<5x32x32xbf16, #tpu.memory_space<vmem>>, %arg3: memref<5x32x1xf32, #tpu.memory_space<vmem>>, %arg4: memref<2x256xf32, #tpu.memory_space<vmem>>) attributes {dimension_semantics = [#tpu.dimension_semantics<parallel>], iteration_bounds = array<i64: 1>, scalar_prefetch = 0 : i64, scratch_operands = 0 : i64, tpu.core_type = #tpu.core_type<tc>, window_params = [{transform_indices = @transform_0, window_bounds = array<i64: 5, 256>}, {pipeline_mode = #tpu.pipeline_mode<synchronous>, transform_indices = @transform_1, window_bounds = array<i64: 5, 32, 32>}, {pipeline_mode = #tpu.pipeline_mode<synchronous>, transform_indices = @transform_2, window_bounds = array<i64: 5, 32, 1>}, {transform_indices = @transform_3, window_bounds = array<i64: 2, 256>}]} {
    %c0 = arith.constant 0 : index
    %c0_0 = arith.constant 0 : index
    %c0_1 = arith.constant 0 : index
    %0 = vector.load %arg2[%c0, %c0_0, %c0_1] : memref<5x32x32xbf16, #tpu.memory_space<vmem>>, vector<1x32x5xbf16>
    %1 = vector.shape_cast %0 : vector<1x32x5xbf16> to vector<32x5xbf16>
    %c1 = arith.constant 1 : index
    %c0_2 = arith.constant 0 : index
    %c0_3 = arith.constant 0 : index
    %2 = vector.load %arg2[%c1, %c0_2, %c0_3] : memref<5x32x32xbf16, #tpu.memory_space<vmem>>, vector<1x32x32xbf16>
    %3 = vector.shape_cast %2 : vector<1x32x32xbf16> to vector<32x32xbf16>
    %c2 = arith.constant 2 : index
    %c0_4 = arith.constant 0 : index
    %c0_5 = arith.constant 0 : index
    %4 = vector.load %arg2[%c2, %c0_4, %c0_5] : memref<5x32x32xbf16, #tpu.memory_space<vmem>>, vector<1x32x32xbf16>
    %5 = vector.shape_cast %4 : vector<1x32x32xbf16> to vector<32x32xbf16>
    %c3 = arith.constant 3 : index
    %c0_6 = arith.constant 0 : index
    %c0_7 = arith.constant 0 : index
    %6 = vector.load %arg2[%c3, %c0_6, %c0_7] : memref<5x32x32xbf16, #tpu.memory_space<vmem>>, vector<1x32x32xbf16>
    %7 = vector.shape_cast %6 : vector<1x32x32xbf16> to vector<32x32xbf16>
    %c4 = arith.constant 4 : index
    %c0_8 = arith.constant 0 : index
    %c0_9 = arith.constant 0 : index
    %8 = vector.load %arg2[%c4, %c0_8, %c0_9] : memref<5x32x32xbf16, #tpu.memory_space<vmem>>, vector<1x2x32xbf16>
    %9 = vector.shape_cast %8 : vector<1x2x32xbf16> to vector<2x32xbf16>
    %c0_10 = arith.constant 0 : index
    %c0_11 = arith.constant 0 : index
    %c0_12 = arith.constant 0 : index
    %10 = vector.load %arg3[%c0_10, %c0_11, %c0_12] : memref<5x32x1xf32, #tpu.memory_space<vmem>>, vector<1x32x1xf32>
    %11 = vector.shape_cast %10 : vector<1x32x1xf32> to vector<32x1xf32>
    %c1_13 = arith.constant 1 : index
    %c0_14 = arith.constant 0 : index
    %c0_15 = arith.constant 0 : index
    %12 = vector.load %arg3[%c1_13, %c0_14, %c0_15] : memref<5x32x1xf32, #tpu.memory_space<vmem>>, vector<1x32x1xf32>
    %13 = vector.shape_cast %12 : vector<1x32x1xf32> to vector<32x1xf32>
    %c2_16 = arith.constant 2 : index
    %c0_17 = arith.constant 0 : index
    %c0_18 = arith.constant 0 : index
    %14 = vector.load %arg3[%c2_16, %c0_17, %c0_18] : memref<5x32x1xf32, #tpu.memory_space<vmem>>, vector<1x32x1xf32>
    %15 = vector.shape_cast %14 : vector<1x32x1xf32> to vector<32x1xf32>
    %c3_19 = arith.constant 3 : index
    %c0_20 = arith.constant 0 : index
    %c0_21 = arith.constant 0 : index
    %16 = vector.load %arg3[%c3_19, %c0_20, %c0_21] : memref<5x32x1xf32, #tpu.memory_space<vmem>>, vector<1x32x1xf32>
    %17 = vector.shape_cast %16 : vector<1x32x1xf32> to vector<32x1xf32>
    %c4_22 = arith.constant 4 : index
    %c0_23 = arith.constant 0 : index
    %c0_24 = arith.constant 0 : index
    %18 = vector.load %arg3[%c4_22, %c0_23, %c0_24] : memref<5x32x1xf32, #tpu.memory_space<vmem>>, vector<1x2x1xf32>
    %19 = vector.shape_cast %18 : vector<1x2x1xf32> to vector<2x1xf32>
    %c0_i32 = arith.constant 0 : i32
    %c256_i32 = arith.constant 256 : i32
    %20 = arith.muli %c0_i32, %c256_i32 : i32
    %21 = tpu.assume_multiple %20, 256 : i32
    %c0_25 = arith.constant 0 : index
    %22 = arith.index_cast %21 : i32 to index
    %23 = vector.load %arg1[%c0_25, %22] : memref<5x256xbf16, #tpu.memory_space<vmem>>, vector<5x256xbf16>
    %cst = arith.constant dense<0.000000e+00> : vector<32x256xf32>
    %24 = tpu.matmul %1, %23, %cst {dimension_numbers = #tpu.dot_dimension_numbers<[1], [0], [0], [1], [0, 0, 1, 1], [], []>} : vector<32x5xbf16>, vector<5x256xbf16>, vector<32x256xf32> -> vector<32x256xf32>
    %25 = vector.broadcast %11 : vector<32x1xf32> to vector<32x256xf32>
    %26 = arith.addf %24, %25 : vector<32x256xf32>
    %27 = math.tanh %26 : vector<32x256xf32>
    %28 = arith.truncf %27 : vector<32x256xf32> to vector<32x256xbf16>
    %cst_26 = arith.constant dense<0.000000e+00> : vector<32x256xf32>
    %29 = tpu.matmul %3, %28, %cst_26 {dimension_numbers = #tpu.dot_dimension_numbers<[1], [0], [0], [1], [0, 0, 1, 1], [], []>} : vector<32x32xbf16>, vector<32x256xbf16>, vector<32x256xf32> -> vector<32x256xf32>
    %30 = vector.broadcast %13 : vector<32x1xf32> to vector<32x256xf32>
    %31 = arith.addf %29, %30 : vector<32x256xf32>
    %32 = math.tanh %31 : vector<32x256xf32>
    %33 = arith.truncf %32 : vector<32x256xf32> to vector<32x256xbf16>
    %cst_27 = arith.constant dense<0.000000e+00> : vector<32x256xf32>
    %34 = tpu.matmul %5, %33, %cst_27 {dimension_numbers = #tpu.dot_dimension_numbers<[1], [0], [0], [1], [0, 0, 1, 1], [], []>} : vector<32x32xbf16>, vector<32x256xbf16>, vector<32x256xf32> -> vector<32x256xf32>
    %35 = vector.broadcast %15 : vector<32x1xf32> to vector<32x256xf32>
    %36 = arith.addf %34, %35 : vector<32x256xf32>
    %37 = math.tanh %36 : vector<32x256xf32>
    %38 = arith.truncf %37 : vector<32x256xf32> to vector<32x256xbf16>
    %cst_28 = arith.constant dense<0.000000e+00> : vector<32x256xf32>
    %39 = tpu.matmul %7, %38, %cst_28 {dimension_numbers = #tpu.dot_dimension_numbers<[1], [0], [0], [1], [0, 0, 1, 1], [], []>} : vector<32x32xbf16>, vector<32x256xbf16>, vector<32x256xf32> -> vector<32x256xf32>
    %40 = vector.broadcast %17 : vector<32x1xf32> to vector<32x256xf32>
    %41 = arith.addf %39, %40 : vector<32x256xf32>
    %42 = math.tanh %41 : vector<32x256xf32>
    %43 = arith.truncf %42 : vector<32x256xf32> to vector<32x256xbf16>
    %cst_29 = arith.constant dense<0.000000e+00> : vector<2x256xf32>
    %44 = tpu.matmul %9, %43, %cst_29 {dimension_numbers = #tpu.dot_dimension_numbers<[1], [0], [0], [1], [0, 0, 1, 1], [], []>} : vector<2x32xbf16>, vector<32x256xbf16>, vector<2x256xf32> -> vector<2x256xf32>
    %45 = vector.broadcast %19 : vector<2x1xf32> to vector<2x256xf32>
    %46 = arith.addf %44, %45 : vector<2x256xf32>
    %c0_30 = arith.constant 0 : index
    %47 = arith.index_cast %21 : i32 to index
    %48 = vector.load %arg4[%c0_30, %47] : memref<2x256xf32, #tpu.memory_space<vmem>>, vector<2x256xf32>
    tpu.vector_store %arg4[%c0_30, %47], %46 {strides = array<i32>} : memref<2x256xf32, #tpu.memory_space<vmem>>, vector<2x256xf32>,
    %c1_i32 = arith.constant 1 : i32
    return
  }
  func.func @transform_0(%arg0: i32) -> (i32, i32) {
    %c0_i32 = arith.constant 0 : i32
    %c0_i32_0 = arith.constant 0 : i32
    return %c0_i32, %arg0 : i32, i32
  }
  func.func @transform_1(%arg0: i32) -> (i32, i32, i32) {
    %c0_i32 = arith.constant 0 : i32
    %c0_i32_0 = arith.constant 0 : i32
    %c0_i32_1 = arith.constant 0 : i32
    %c0_i32_2 = arith.constant 0 : i32
    return %c0_i32, %c0_i32_0, %c0_i32_1 : i32, i32, i32
  }
  func.func @transform_2(%arg0: i32) -> (i32, i32, i32) {
    %c0_i32 = arith.constant 0 : i32
    %c0_i32_0 = arith.constant 0 : i32
    %c0_i32_1 = arith.constant 0 : i32
    %c0_i32_2 = arith.constant 0 : i32
    return %c0_i32, %c0_i32_0, %c0_i32_1 : i32, i32, i32
  }
  func.func @transform_3(%arg0: i32) -> (i32, i32) {
    %c0_i32 = arith.constant 0 : i32
    %c0_i32_0 = arith.constant 0 : i32
    return %c0_i32, %arg0 : i32, i32
  }
}

</mosaic_0001>

<bundles_post_ra>
// kernel: tpu_custom_call.1
= control target key start
LH: loop header
LB: loop body
LE: loop exit
PB: predicated region body
PF: predicated region fallthrough
CT: control target
= control target key end

     0   :  { %vm101_vm0 = vcmask 1041408   ;;  %vm102_vm1 = vcmask 1042432   ;;  %v704_v2 = vmov 65535   ;;  %v705_v5 = vmov 0   ;;  %s838_s0 = inlined_call_operand.vmem [shape: bf16[5,256], index: 0, kind: input, shape index: {}]   ;;  %s839_s1 = inlined_call_operand.vmem [shape: bf16[5,32,32], index: 1, kind: input, shape index: {}]   ;;  %s840_s2 = inlined_call_operand.vmem [shape: f32[5,32,1], index: 2, kind: input, shape index: {}]   ;;  %s841_s3 = inlined_call_operand.hbm [shape: f32[2,256], index: 3, kind: output, shape index: {}]  }
   0x1   :  { %v58_v0 = vld [vmem:[%s838_s0] sm:$0x77]  ;;  %v103_v3 = vsel %vm101_vm0, 4294967295, %v704_v2  ;;  %143 = vmatprep.mubr.bf16.mxu0 %v705_v5  ;;  %604 = vset.pattern.permute.xlu0 %v705_v5  ;;  %v39_v10 = vld [vmem:[%s840_s2 + $0x10] sm:$0xff]  ;;  %v38_v12 = vld [vmem:[%s840_s2 + $0x8] sm:$0xff]  ;;  %vm94_vm2 = vcmask 39936  }
   0x2   :  { %v584_v1 = vcombine.high %v58_v0, %v58_v0  ;;  %v583_v4 = vcombine.low %v58_v0, %v58_v0  ;;  %v104_v6 = vsel %vm102_vm1, %v103_v3, 0  ;;  %605 = vset.pattern.permute.xlu1 %v705_v5  ;;  %245 = vmatprep.mubr.bf16.mxu1 %v705_v5  ;;  %v37_v9 = vld [vmem:[%s840_s2] sm:$0xff]  ;;  %v40_v13 = vld [vmem:[%s840_s2 + $0x18] sm:$0xff]  ;;  %v569_v15 = vld [vmem:[%s840_s2 + $0x28] sm:$0xff] }
   0x3   :  { %61 = vperm.xlu0 %604, %v37_v9   ;;  %v608_v11 = vld [vmem:[%s839_s1] sm:$0xff]   ;;  %71 = vperm.xlu1 %605, %v39_v10   ;;  %v609_v16 = vld [vmem:[%s839_s1 + $0x8] sm:$0xff]   ;;  %v570_v17 = vld [vmem:[%s840_s2 + $0x30] sm:$0xff] }
   0x4   :  { %v109_v7 = vand.u32 %v584_v1, %v104_v6  ;;  %v106_v8 = vand.u32 %v583_v4, %v104_v6  ;;  %v568_v14 = vld [vmem:[%s840_s2 + $0x20] sm:$0xff] }
   0x6   :  { %111 = vmatprep.subr.bf16.mxu0 %v109_v7 }
   0x7   :  { %112 = vmatpush1.bf16.msra.mxu0 %v106_v8  ;;  %66 = vperm.xlu0 %604, %v38_v12  }
   0x8   :  { %76 = vperm.xlu1 %605, %v40_v13  }
   0xa   :  { %585 = vmatmul.mubr.msk.bf16.vlgmr.msra.gmra.mrb[0].mxu0 %vm94_vm2, %v608_v11 }
   0xb   :  { %153 = vmatprep.mubr.bf16.mxu0 %v705_v5  ;;  %178 = vperm.xlu0 %604, %v568_v14  }
   0xc   :  { %183 = vperm.xlu1 %605, %v569_v15  }
   0xd   :  { %8 = vsyncpa [#allocation3], 0  ;;  %v571_v18 = vld [vmem:[%s840_s2 + $0x38] sm:$0xff]  ;;  %v572_v19 = vld [vmem:[%s840_s2 + $0x40] sm:$0xff]  ;;  %vm206_vm3 = vcmask 261120   ;;  %s706_s9 = smov [#allocation2]  }
   0xe   :  { %v573_v20 = vld [vmem:[%s840_s2 + $0x48] sm:$0xff]  ;;  %v574_v21 = vld [vmem:[%s840_s2 + $0x50] sm:$0xff]  ;;  %v575_v22 = vld [vmem:[%s840_s2 + $0x58] sm:$0xff]  ;;  %s547_s10 = sshll.u32 %s706_s9, 4  ;;  %s548_s10 = int_to_ptr.vmem [resolvable:$true] %s547_s10 }
   0xf   :  { %188 = vperm.xlu0 %604, %v570_v17   ;;  %v576_v23 = vld [vmem:[%s840_s2 + $0x60] sm:$0xff]  ;;  %v577_v24 = vld [vmem:[%s840_s2 + $0x68] sm:$0xff]  ;;  %v578_v25 = vld [vmem:[%s840_s2 + $0x70] sm:$0xff]  ;;  %s680_s11 = scalar_lea.vmem %s548_s10, 64  ;;  %p685_p1 = scmp.lt.s32.totalorder %s548_s10, %s548_s10 }
  0x10   :  { %193 = vperm.xlu1 %605, %v571_v18   ;;  %v579_v26 = vld [vmem:[%s840_s2 + $0x78] sm:$0xff]  ;;  %v580_v27 = vld [vmem:[%s840_s2 + $0x80] sm:$0x3]  ;;  %v610_v60 = vld [vmem:[%s839_s1 + $0x10] sm:$0xff]   ;;  %p681_p0 = scmp.ne.s32.totalorder %s548_s10, %s680_s11  ;;  %p686_p2 = scmp.lt.s32.totalorder %s680_s11, %s680_s11 }
  0x11   :  { %v611_v61 = vld [vmem:[%s839_s1 + $0x18] sm:$0xff]  }
  0x12   :  { %586 = vmatmul.mubr.msk.bf16.gmra.mrb[4].mxu0 %vm94_vm2, %v609_v16  ;;  %p687_p3 = por %p686_p2, %p685_p1 }
  0x13   :  { %346 = vmatprep.mubr.bf16.mxu0 %v705_v5  ;;  %280 = vperm.xlu0 %604, %v572_v19  }
  0x14   :  { %285 = vperm.xlu1 %605, %v573_v20   ;;  %p688_p4 = pnand %p687_p3, %p681_p0 }
  0x17   :  { %290 = vperm.xlu0 %604, %v574_v21  }
  0x18   :  { %295 = vperm.xlu1 %605, %v575_v22  }
  0x1b   :  { %381 = vperm.xlu0 %604, %v576_v23  }
  0x1c   :  { %386 = vperm.xlu1 %605, %v577_v24  }
  0x1f   :  { %391 = vperm.xlu0 %604, %v578_v25  }
  0x20   :  { %396 = vperm.xlu1 %605, %v579_v26  }
  0x23   :  { %482 = vperm.xlu0 %604, %v580_v27  }
  0x82   :  { %v62_v28 = vpop.permute.xlu0 %61  ;;  %v72_v37 = vpop.permute.xlu1 %71 }
  0x86   :  { %v67_v32 = vpop.permute.xlu0 %66 }
  0x87   :  { %v77_v42 = vpop.permute.xlu1 %76 }
  0x8a   :  { %v179_v62 = vpop.permute.xlu0 %178 }
  0x8b   :  { %v184_v2 = vpop.permute.xlu1 %183 }
  0x8e   :  { %v189_v9 = vpop.permute.xlu0 %188 }
  0x8f   :  { %v194_v13 = vpop.permute.xlu1 %193 }
  0xdd   :  { %v145_v29 = vpop.f32.mrb[0].mxu0 }
  0xde   :  { %v146_v30 = vadd.f32 %v145_v29, %v62_v28  ;;  %v147_v31 = vpop.f32.mrb[1].mxu0 }
  0xdf   :  { %v148_v33 = vadd.f32 %v147_v31, %v62_v28  ;;  %v149_v34 = vpop.f32.mrb[2].mxu0  ;;  %v612_v31 = vld [vmem:[%s839_s1 + $0x20] sm:$0xff]  }
  0xe0   :  { %616 = vtanh.f32 %v146_v30  ;;  %v150_v35 = vadd.f32 %v149_v34, %v67_v32  ;;  %v151_v36 = vpop.f32.mrb[3].mxu0 }
  0xe1   :  { %618 = vtanh.f32 %v148_v33  ;;  %v152_v38 = vadd.f32 %v151_v36, %v67_v32  ;;  %v613_v32 = vld [vmem:[%s839_s1 + $0x28] sm:$0xff]   ;;  %v281_v33 = vpop.permute.xlu0 %280 }
  0xe2   :  { %620 = vtanh.f32 %v150_v35 }
  0xe3   :  { %622 = vtanh.f32 %v152_v38 }
  0xe5   :  { %v155_v39 = vpop.f32.mrb[4].mxu0 }
  0xe6   :  { %v156_v40 = vadd.f32 %v155_v39, %v72_v37  ;;  %v157_v41 = vpop.f32.mrb[5].mxu0 }
  0xe7   :  { %v158_v43 = vadd.f32 %v157_v41, %v72_v37  ;;  %v159_v44 = vpop.f32.mrb[6].mxu0  ;;  %v286_v37 = vpop.permute.xlu1 %285 }
  0xe8   :  { %624 = vtanh.f32 %v156_v40  ;;  %v160_v45 = vadd.f32 %v159_v44, %v77_v42  ;;  %v161_v46 = vpop.f32.mrb[7].mxu0 }
  0xe9   :  { %626 = vtanh.f32 %v158_v43  ;;  %v162_v47 = vadd.f32 %v161_v46, %v77_v42  ;;  %v291_v43 = vpop.permute.xlu0 %290 }
  0xea   :  { %v617_v48 = vpop.eup %616  ;;  %628 = vtanh.f32 %v160_v45 }
  0xeb   :  { %v619_v49 = vpop.eup %618  ;;  %630 = vtanh.f32 %v162_v47  ;;  %v296_v47 = vpop.permute.xlu1 %295 }
  0xec   :  { %v621_v50 = vpop.eup %620 }
  0xed   :  { %v623_v51 = vpop.eup %622  ;;  %v172_v52 = vpack.c.bf16 %v621_v50, %v617_v48 }
  0xee   :  { %v173_v53 = vpack.c.bf16 %v623_v51, %v619_v49 }
  0xf0   :  { %213 = vmatprep.subr.bf16.mxu1 %v173_v53 }
  0xf1   :  { %214 = vmatpush1.bf16.msra.mxu1 %v172_v52 }
  0xf2   :  { %v625_v54 = vpop.eup %624 }
  0xf3   :  { %v627_v55 = vpop.eup %626 }
  0xf4   :  { %v629_v56 = vpop.eup %628 }
  0xf5   :  { %v631_v57 = vpop.eup %630  ;;  %v174_v58 = vpack.c.bf16 %v629_v56, %v625_v54 }
  0xf6   :  { %v175_v59 = vpack.c.bf16 %v631_v57, %v627_v55 }
  0xf8   :  { %215 = vmatprep.subr.bf16.mxu1 %v175_v59 }
  0xf9   :  { %216 = vmatpush1.bf16.msra.mxu1 %v174_v58 }
  0xfc   :  { %589 = vmatmul.mubr.msk.bf16.vlgmr.msra.gmra.mrb[0].mxu1 %vm206_vm3, %v610_v60 }
  0xfd   :  { %255 = vmatprep.mubr.bf16.mxu1 %v705_v5 }
 0x104   :  { %590 = vmatmul.mubr.msk.bf16.gmra.mrb[4].mxu1 %vm206_vm3, %v611_v61 }
 0x105   :  { %447 = vmatprep.mubr.bf16.mxu1 %v705_v5 }
 0x1cf   :  { %v247_v63 = vpop.f32.mrb[0].mxu1 }
 0x1d0   :  { %v248_v0 = vadd.f32 %v247_v63, %v179_v62  ;;  %v249_v1 = vpop.f32.mrb[1].mxu1 }
 0x1d1   :  { %v250_v3 = vadd.f32 %v249_v1, %v179_v62  ;;  %v251_v4 = vpop.f32.mrb[2].mxu1  ;;  %v614_v1 = vld [vmem:[%s839_s1 + $0x30] sm:$0xff]  }
 0x1d2   :  { %632 = vtanh.f32 %v248_v0  ;;  %v252_v6 = vadd.f32 %v251_v4, %v184_v2  ;;  %v253_v7 = vpop.f32.mrb[3].mxu1 }
 0x1d3   :  { %634 = vtanh.f32 %v250_v3  ;;  %v254_v8 = vadd.f32 %v253_v7, %v184_v2  ;;  %v615_v2 = vld [vmem:[%s839_s1 + $0x38] sm:$0xff]   ;;  %v382_v3 = vpop.permute.xlu0 %381 }
 0x1d4   :  { %636 = vtanh.f32 %v252_v6 }
 0x1d5   :  { %638 = vtanh.f32 %v254_v8  ;;  %v387_v8 = vpop.permute.xlu1 %386 }
 0x1d7   :  { %v257_v10 = vpop.f32.mrb[4].mxu1 }
 0x1d8   :  { %v258_v11 = vadd.f32 %v257_v10, %v189_v9  ;;  %v259_v12 = vpop.f32.mrb[5].mxu1 }
 0x1d9   :  { %v260_v14 = vadd.f32 %v259_v12, %v189_v9  ;;  %v261_v15 = vpop.f32.mrb[6].mxu1 }
 0x1da   :  { %640 = vtanh.f32 %v258_v11  ;;  %v262_v16 = vadd.f32 %v261_v15, %v194_v13  ;;  %v263_v17 = vpop.f32.mrb[7].mxu1 }
 0x1db   :  { %642 = vtanh.f32 %v260_v14  ;;  %v264_v18 = vadd.f32 %v263_v17, %v194_v13  ;;  %v397_v17 = vpop.permute.xlu1 %396 }
 0x1dc   :  { %v633_v19 = vpop.eup %632  ;;  %644 = vtanh.f32 %v262_v16 }
 0x1dd   :  { %v635_v20 = vpop.eup %634  ;;  %646 = vtanh.f32 %v264_v18 }
 0x1de   :  { %v637_v21 = vpop.eup %636 }
 0x1df   :  { %v639_v22 = vpop.eup %638  ;;  %v274_v23 = vpack.c.bf16 %v637_v21, %v633_v19 }
 0x1e0   :  { %v275_v24 = vpack.c.bf16 %v639_v22, %v635_v20 }
 0x1e2   :  { %314 = vmatprep.subr.bf16.mxu0 %v275_v24 }
 0x1e3   :  { %315 = vmatpush1.bf16.msra.mxu0 %v274_v23 }
 0x1e4   :  { %v641_v25 = vpop.eup %640 }
 0x1e5   :  { %v643_v26 = vpop.eup %642 }
 0x1e6   :  { %v645_v27 = vpop.eup %644 }
 0x1e7   :  { %v647_v28 = vpop.eup %646  ;;  %v276_v29 = vpack.c.bf16 %v645_v27, %v641_v25 }
 0x1e8   :  { %v277_v30 = vpack.c.bf16 %v647_v28, %v643_v26 }
 0x1ea   :  { %316 = vmatprep.subr.bf16.mxu0 %v277_v30 }
 0x1eb   :  { %317 = vmatpush1.bf16.msra.mxu0 %v276_v29 }
 0x1ee   :  { %593 = vmatmul.mubr.msk.bf16.vlgmr.msra.gmra.mrb[8].mxu0 %vm206_vm3, %v612_v31 }
 0x1ef   :  { %356 = vmatprep.mubr.bf16.mxu0 %v705_v5 }
 0x1f6   :  { %594 = vmatmul.mubr.msk.bf16.gmra.mrb[12].mxu0 %vm206_vm3, %v613_v32 }
 0x1f7   :  { %520 = vmatprep.mubr.bf16.mxu0 %v705_v5 }
 0x2c1   :  { %v348_v34 = vpop.f32.mrb[8].mxu0 }
 0x2c2   :  { %v349_v35 = vadd.f32 %v348_v34, %v281_v33  ;;  %v350_v36 = vpop.f32.mrb[9].mxu0 }
 0x2c3   :  { %v351_v38 = vadd.f32 %v350_v36, %v281_v33  ;;  %v352_v39 = vpop.f32.mrb[10].mxu0 }
 0x2c4   :  { %648 = vtanh.f32 %v349_v35  ;;  %v353_v40 = vadd.f32 %v352_v39, %v286_v37  ;;  %v354_v41 = vpop.f32.mrb[11].mxu0  ;;  %v567_v35 = vld [vmem:[%s839_s1 + $0x40] sm:$0x1] }
 0x2c5   :  { %650 = vtanh.f32 %v351_v38  ;;  %v355_v42 = vadd.f32 %v354_v41, %v286_v37 }
 0x2c6   :  { %652 = vtanh.f32 %v353_v40 }
 0x2c7   :  { %654 = vtanh.f32 %v355_v42 }
 0x2c9   :  { %v358_v44 = vpop.f32.mrb[12].mxu0 }
 0x2ca   :  { %v359_v45 = vadd.f32 %v358_v44, %v291_v43  ;;  %v360_v46 = vpop.f32.mrb[13].mxu0 }
 0x2cb   :  { %v361_v48 = vadd.f32 %v360_v46, %v291_v43  ;;  %v362_v49 = vpop.f32.mrb[14].mxu0 }
 0x2cc   :  { %656 = vtanh.f32 %v359_v45  ;;  %v363_v50 = vadd.f32 %v362_v49, %v296_v47  ;;  %v364_v51 = vpop.f32.mrb[15].mxu0 }
 0x2cd   :  { %658 = vtanh.f32 %v361_v48  ;;  %v365_v52 = vadd.f32 %v364_v51, %v296_v47 }
 0x2ce   :  { %v649_v53 = vpop.eup %648  ;;  %660 = vtanh.f32 %v363_v50 }
 0x2cf   :  { %v651_v54 = vpop.eup %650  ;;  %662 = vtanh.f32 %v365_v52 }
 0x2d0   :  { %v653_v55 = vpop.eup %652 }
 0x2d1   :  { %v655_v56 = vpop.eup %654  ;;  %v375_v57 = vpack.c.bf16 %v653_v55, %v649_v53 }
 0x2d2   :  { %v376_v58 = vpack.c.bf16 %v655_v56, %v651_v54 }
 0x2d4   :  { %415 = vmatprep.subr.bf16.mxu1 %v376_v58 }
 0x2d5   :  { %416 = vmatpush1.bf16.msra.mxu1 %v375_v57 }
 0x2d6   :  { %v657_v59 = vpop.eup %656 }
 0x2d7   :  { %v659_v60 = vpop.eup %658 }
 0x2d8   :  { %v661_v61 = vpop.eup %660 }
 0x2d9   :  { %v663_v62 = vpop.eup %662  ;;  %v377_v63 = vpack.c.bf16 %v661_v61, %v657_v59 }
 0x2da   :  { %v378_v0 = vpack.c.bf16 %v663_v62, %v659_v60 }
 0x2dc   :  { %417 = vmatprep.subr.bf16.mxu1 %v378_v0 }
 0x2dd   :  { %418 = vmatpush1.bf16.msra.mxu1 %v377_v63 }
 0x2e0   :  { %597 = vmatmul.mubr.msk.bf16.vlgmr.msra.gmra.mrb[8].mxu1 %vm206_vm3, %v614_v1 }
 0x2e1   :  { %457 = vmatprep.mubr.bf16.mxu1 %v705_v5  ;;  %v392_v5 = vpop.permute.xlu0 %391 }
 0x2e5   :  { %v483_v36 = vpop.permute.xlu0 %482 }
 0x2e8   :  { %598 = vmatmul.mubr.msk.bf16.gmra.mrb[12].mxu1 %vm206_vm3, %v615_v2 }
 0x3b3   :  { %v449_v4 = vpop.f32.mrb[8].mxu1 }
 0x3b4   :  { %v450_v6 = vadd.f32 %v449_v4, %v382_v3  ;;  %v451_v7 = vpop.f32.mrb[9].mxu1 }
 0x3b5   :  { %v452_v9 = vadd.f32 %v451_v7, %v382_v3  ;;  %v453_v10 = vpop.f32.mrb[10].mxu1 }
 0x3b6   :  { %664 = vtanh.f32 %v450_v6  ;;  %v454_v11 = vadd.f32 %v453_v10, %v387_v8  ;;  %v455_v12 = vpop.f32.mrb[11].mxu1 }
 0x3b7   :  { %666 = vtanh.f32 %v452_v9  ;;  %v456_v13 = vadd.f32 %v455_v12, %v387_v8 }
 0x3b8   :  { %668 = vtanh.f32 %v454_v11 }
 0x3b9   :  { %670 = vtanh.f32 %v456_v13 }
 0x3bb   :  { %v459_v14 = vpop.f32.mrb[12].mxu1 }
 0x3bc   :  { %v460_v15 = vadd.f32 %v459_v14, %v392_v5  ;;  %v461_v16 = vpop.f32.mrb[13].mxu1 }
 0x3bd   :  { %v462_v18 = vadd.f32 %v461_v16, %v392_v5  ;;  %v463_v19 = vpop.f32.mrb[14].mxu1 }
 0x3be   :  { %672 = vtanh.f32 %v460_v15  ;;  %v464_v20 = vadd.f32 %v463_v19, %v397_v17  ;;  %v465_v21 = vpop.f32.mrb[15].mxu1 }
 0x3bf   :  { %674 = vtanh.f32 %v462_v18  ;;  %v466_v22 = vadd.f32 %v465_v21, %v397_v17 }
 0x3c0   :  { %v665_v23 = vpop.eup %664  ;;  %676 = vtanh.f32 %v464_v20 }
 0x3c1   :  { %v667_v24 = vpop.eup %666  ;;  %678 = vtanh.f32 %v466_v22 }
 0x3c2   :  { %v669_v25 = vpop.eup %668 }
 0x3c3   :  { %v671_v26 = vpop.eup %670  ;;  %v476_v27 = vpack.c.bf16 %v669_v25, %v665_v23 }
 0x3c4   :  { %v477_v28 = vpack.c.bf16 %v671_v26, %v667_v24 }
 0x3c6   :  { %488 = vmatprep.subr.bf16.mxu0 %v477_v28 }
 0x3c7   :  { %489 = vmatpush1.bf16.msra.mxu0 %v476_v27 }
 0x3c8   :  { %v673_v29 = vpop.eup %672 }
 0x3c9   :  { %v675_v30 = vpop.eup %674 }
 0x3ca   :  { %v677_v31 = vpop.eup %676 }
 0x3cb   :  { %v679_v32 = vpop.eup %678  ;;  %v478_v33 = vpack.c.bf16 %v677_v31, %v673_v29 }
 0x3cc   :  { %v479_v34 = vpack.c.bf16 %v679_v32, %v675_v30 }
 0x3ce   :  { %490 = vmatprep.subr.bf16.mxu0 %v479_v34 }
 0x3cf   :  { %491 = vmatpush1.bf16.msra.mxu0 %v478_v33 }
 0x3d2   :  { %599 = vmatmul.mubr.msk.bf16.vlgmr.msra.gmra.mrb[16].mxu0 %vm206_vm3, %v567_v35 }
 0x4a5   :  { %v522_v37 = vpop.f32.mrb[16].mxu0 }
 0x4a6   :  { %v523_v38 = vadd.f32 %v522_v37, %v483_v36  ;;  %v524_v39 = vpop.f32.mrb[17].mxu0 }
 0x4a7   :  { %v525_v40 = vadd.f32 %v524_v39, %v483_v36  ;;  %v526_v41 = vpop.f32.mrb[18].mxu0 }
 0x4a8   :  { %v527_v42 = vpop.f32.mrb[19].mxu0 }
 0x4a9   :  { %v531_v43 = vcombine.low %v523_v38, %v525_v40 }
 0x4ab   :  { %600 = vst.sshfl [vmem:[#allocation2] sm:$0x33 pattern:$0x76325410] %v531_v43 }
 0x4ac   :  { %691 = shalt.err (!%p688_p4)
}
 0x4ad   :  { %s692_s13 = scalar_lea.hbm %s841_s3, 64 }
 0x4ae   :  { %p693_p5 = scmp.ne.s32.totalorder %s841_s3, %s692_s13  ;;  %p696_p6 = scmp.lt.u32.totalorder %s692_s13, %s841_s3 }
 0x4b0   :  { %p698_p7 = pnand %p696_p6, %p693_p5 }
 0x4b2   :  { %701 = shalt.err (!%p698_p7)
}
 0x4b3   :  { %550 = dma.vmem_to_hbm [thread:$0]  %s548_s10, 64, %s841_s3, [#allocation3]  }
 0x4b4   :  { %702 = dma.done.wait [#allocation3], 64  }
 0x4b5   :  { %703 = vsyncadd [#allocation3], 4294967232 }
 0x4b6   :  { %554 = vsyncpa [#allocation3], 1 }

</bundles_post_ra>
